<compile_context>
chip_gen: v7x
topology: tpu7x:2x2x1
jax: 0.10.0
libtpu: 0.0.40
codegen_flags: <defaults>
</compile_context>

<pallas_src>
import functools

import jax
import jax.numpy as jnp
from jax.experimental import pallas as pl
from jax.experimental.pallas import tpu as pltpu


def _reduce_tile_to_vreg(focal, tm, lane):
    # Reduce a (tm, lane) tile to one (8, lane) vreg with pure VPU adds.
    # Two-stage when possible: ~8 independent accumulator chains instead of a
    # single serial (tm/8)-deep add chain (visible at tm >= 2048).
    if tm % 64 == 0:
        return focal.reshape(tm // 64, 8, 8, lane).sum(axis=0).sum(axis=0)
    return focal.reshape(tm // 8, 8, lane).sum(axis=0)


def _focal_loss_kernel(x_ref, t_ref, o_ref, *, alpha, gamma, pos_weight,
                       rows, tm, lane, nblocks, blocks_per_core, has_dup):
    c = pl.program_id(0)          # core axis ("parallel")
    i = pl.program_id(1)          # reduction axis ("arbitrary")
    blk = c * blocks_per_core + i

    @pl.when(i == 0)
    def _():
        o_ref[...] = jnp.zeros_like(o_ref)

    def _compute_and_accumulate():
        x = x_ref[...].astype(jnp.float32)
        t = t_ref[...].astype(jnp.float32)

        # Numerically stable BCE-with-logits (== binary_cross_entropy_with_logits):
        #   softplus(z) = max(z, 0) + log1p(exp(-|z|))
        log1p_term = jnp.log1p(jnp.exp(-jnp.abs(x)))
        if pos_weight == 1.0:
            # bce = softplus(x) - x*t
            bce = jnp.maximum(x, 0.0) - x * t + log1p_term
        else:
            log_sig = -(jnp.maximum(-x, 0.0) + log1p_term)
            log_one_minus_sig = -(jnp.maximum(x, 0.0) + log1p_term)
            bce = -(pos_weight * t * log_sig + (1.0 - t) * log_one_minus_sig)

        one_minus_pt = 1.0 - jnp.exp(-bce)   # p_t = exp(-bce), as in the module

        # Specialize common integer gammas to avoid a generic powf on the EUP.
        if gamma == 2.0:
            modulator = one_minus_pt * one_minus_pt
        elif gamma == 1.0:
            modulator = one_minus_pt
        elif gamma == 0.0:
            modulator = None
        else:
            modulator = one_minus_pt ** gamma

        # alpha*t + (1-alpha)*(1-t) folded to 2 VALU ops.
        weight = (1.0 - alpha) + (2.0 * alpha - 1.0) * t
        focal = weight * bce if modulator is None else (weight * modulator) * bce

        if rows % tm != 0:
            # Only the ragged last row-block needs masking: rows beyond `rows`
            # in that tile hold undefined data.  The mask is a select applied
            # AFTER the purely elementwise chain, so any NaN/Inf produced from
            # garbage rows cannot leak into the sum.  Row-granularity mask ->
            # no int32 global-index overflow even for very large n.
            last = nblocks - 1
            rows_left = rows - last * tm       # static (== rows % tm)

            @pl.when(blk == last)
            def _():
                row_ids = jax.lax.broadcasted_iota(jnp.int32, (tm, lane), 0)
                masked = jnp.where(row_ids < rows_left, focal, 0.0)
                o_ref[...] += _reduce_tile_to_vreg(masked, tm, lane)[None]

            @pl.when(blk != last)
            def _():
                o_ref[...] += _reduce_tile_to_vreg(focal, tm, lane)[None]
        else:
            o_ref[...] += _reduce_tile_to_vreg(focal, tm, lane)[None]

    if has_dup:
        # When ncores*bpc > nblocks the last core re-reads a clamped duplicate
        # of block nblocks-1; skip its accumulation entirely.
        @pl.when(blk < nblocks)
        def _():
            _compute_and_accumulate()
    else:
        _compute_and_accumulate()


def _round_up(a, b):
    return ((a + b - 1) // b) * b


def _cdiv(a, b):
    return -(-a // b)


def _detect_num_tensorcores():
    # Best-effort: split the reduction across the 2 TensorCores on v7x-class
    # chips; v5e/v6e (1 TC) use a single-core grid (no dead axis / no wasted
    # duplicate-block DMA).
    # TODO(synk): on v7x verify "parallel" actually shards across both TCs; if
    # not, switch axis 0 to pltpu.CORE_PARALLEL or pl.core_map.
    try:
        kind = jax.devices()[0].device_kind.lower()
    except Exception:
        return 1
    return 2 if ("v7" in kind or "tpu7" in kind) else 1


def _focal_elementwise(x, t, alpha, gamma, pos_weight):
    # Plain-JAX per-element focal loss: used for the <=127-element ragged tail
    # and as the reference implementation in the self-test.
    x = x.astype(jnp.float32)
    t = t.astype(jnp.float32)
    log1p_term = jnp.log1p(jnp.exp(-jnp.abs(x)))
    log_sig = -(jnp.maximum(-x, 0.0) + log1p_term)
    log_one_minus_sig = -(jnp.maximum(x, 0.0) + log1p_term)
    bce = -(pos_weight * t * log_sig + (1.0 - t) * log_one_minus_sig)
    p_t = jnp.exp(-bce)
    weight = alpha * t + (1.0 - alpha) * (1.0 - t)
    return weight * (1.0 - p_t) ** gamma * bce


def focal_loss(inputs, targets, *, alpha=0.9, gamma=2.0, reduction="mean",
               pos_weight=None, tm=2048, lane=128, num_cores=None):
    """Pallas implementation of FocalLoss.forward for reduction in {'mean','sum'}.

    pos_weight: scalar float or None (None -> 1.0).
    """
    # TODO(synk): per-class (tensor) pos_weight and reduction='none' are not
    # implemented in-kernel; only scalar pos_weight and 'mean'/'sum' are.
    if pos_weight is None:
        pos_weight = 1.0
    assert reduction in ("mean", "sum"), "reduction='none' not implemented"

    alpha = float(alpha)
    gamma = float(gamma)
    pos_weight = float(pos_weight)

    n = int(inputs.size)
    assert n > 0
    x_flat = inputs.reshape(-1)     # keep native dtype (bf16 ok); cast in-kernel
    t_flat = targets.reshape(-1)

    n_aligned = (n // lane) * lane
    tail_n = n - n_aligned

    total = jnp.float32(0.0)

    if n_aligned > 0:
        rows = n_aligned // lane
        if tail_n:
            # Lane-aligned prefix (no full-tensor jnp.pad copy); the tiny tail
            # is added below in plain JAX.
            x2 = x_flat[:n_aligned].reshape(rows, lane)
            t2 = t_flat[:n_aligned].reshape(rows, lane)
        else:
            # Fast path: a pure reshape, zero extra HBM traffic.
            x2 = x_flat.reshape(rows, lane)
            t2 = t_flat.reshape(rows, lane)

        # Large tiles amortize per-grid-step overhead; shrink for small inputs
        # so the block never exceeds the (sublane-rounded) array extent.
        tm_eff = _round_up(min(int(tm), _round_up(rows, 8)), 8)
        nblocks = _cdiv(rows, tm_eff)

        ncores = num_cores if num_cores is not None else _detect_num_tensorcores()
        ncores = max(1, min(int(ncores), nblocks))
        bpc = _cdiv(nblocks, ncores)            # row-blocks per core
        has_dup = ncores * bpc > nblocks

        if has_dup:
            def in_map(c, i):
                # Clamp logical over-coverage (last core only); the duplicate
                # block's accumulation is skipped in-kernel.
                return (jnp.minimum(c * bpc + i, nblocks - 1), 0)
        else:
            def in_map(c, i):
                return (c * bpc + i, 0)

        kernel = functools.partial(
            _focal_loss_kernel,
            alpha=alpha, gamma=gamma, pos_weight=pos_weight,
            rows=rows, tm=tm_eff, lane=int(lane),
            nblocks=nblocks, blocks_per_core=bpc, has_dup=has_dup,
        )

        tile_spec = pl.BlockSpec((tm_eff, lane), in_map)
        # Explicit VMEM budget: 2 inputs x 2 buffers x tile + elementwise
        # temporaries; cap leaves headroom on v7x's 64 MiB/TC.
        tile_bytes = tm_eff * lane * 4
        vmem_limit = min(max(32 * 1024 * 1024, 16 * tile_bytes),
                         48 * 1024 * 1024)

        partials = pl.pallas_call(
            kernel,
            out_shape=jax.ShapeDtypeStruct((ncores, 8, lane), jnp.float32),
            grid_spec=pltpu.PrefetchScalarGridSpec(
                num_scalar_prefetch=0,
                grid=(ncores, bpc),
                in_specs=[tile_spec, tile_spec],
                out_specs=pl.BlockSpec((1, 8, lane), lambda c, i: (c, 0, 0)),
            ),
            compiler_params=pltpu.CompilerParams(
                dimension_semantics=("parallel", "arbitrary"),
                vmem_limit_bytes=vmem_limit),
        )(x2, t2)

        # Tiny epilogue in plain JAX: cross-lane/core reduce.
        total = jnp.sum(partials)

    if tail_n:
        x_tail = x_flat[n_aligned:]
        t_tail = t_flat[n_aligned:]
        total = total + jnp.sum(
            _focal_elementwise(x_tail, t_tail, alpha, gamma, pos_weight))

    if reduction == "mean":
        return total / n
    return total


def _focal_loss_ref(inputs, targets, alpha=0.9, gamma=2.0, pos_weight=1.0,
                    reduction="mean"):
    focal = _focal_elementwise(inputs.reshape(-1), targets.reshape(-1),
                               alpha, gamma, pos_weight)
    return jnp.mean(focal) if reduction == "mean" else jnp.sum(focal)


if __name__ == "__main__":
    key = jax.random.PRNGKey(0)
    k1, k2, k3, k4 = jax.random.split(key, 4)

    # NCHW logits and binary targets; 2*4*16*16 = 2048 (lane-aligned fast path).
    x1 = jax.random.normal(k1, (2, 4, 16, 16), dtype=jnp.float32) * 2.0
    t1 = jax.random.bernoulli(k2, 0.3, (2, 4, 16, 16)).astype(jnp.float32)
    out1 = jax.block_until_ready(focal_loss(x1, t1, alpha=0.9, gamma=2.0,
                                            reduction="mean"))
    ref1 = _focal_loss_ref(x1, t1, alpha=0.9, gamma=2.0)
    assert jnp.allclose(out1, ref1, rtol=1e-5, atol=1e-6), (out1, ref1)

    # Non-lane-aligned shape (exercises the ragged-row mask + plain-JAX tail)
    # with non-default alpha/gamma/pos_weight and 'sum' reduction.
    x2 = jax.random.normal(k3, (2, 3, 7, 11), dtype=jnp.float32)
    t2 = jax.random.bernoulli(k4, 0.5, (2, 3, 7, 11)).astype(jnp.float32)
    out2 = jax.block_until_ready(
        focal_loss(x2, t2, alpha=0.75, gamma=1.5, pos_weight=2.0,
                   reduction="sum"))
    ref2 = _focal_loss_ref(x2, t2, alpha=0.75, gamma=1.5, pos_weight=2.0,
                           reduction="sum")
    assert jnp.allclose(out2, ref2, rtol=1e-5, atol=1e-5), (out2, ref2)

    print("KERNEL_OK")
</pallas_src>

<mosaic_0001>
module attributes {stable_mosaic.version = 11 : i64} {
  func.func @_focal_loss_kernel(%arg0: i32, %arg1: i32, %arg2: memref<16x128xf32, #tpu.memory_space<vmem>>, %arg3: memref<16x128xf32, #tpu.memory_space<vmem>>, %arg4: memref<1x8x128xf32, #tpu.memory_space<vmem>>) attributes {dimension_semantics = [#tpu.dimension_semantics<parallel>, #tpu.dimension_semantics<arbitrary>], iteration_bounds = array<i64: 1, 1>, scalar_prefetch = 0 : i64, scratch_operands = 0 : i64, tpu.core_type = #tpu.core_type<tc>, window_params = [{transform_indices = @transform_0, window_bounds = array<i64: 16, 128>}, {transform_indices = @transform_1, window_bounds = array<i64: 16, 128>}, {transform_indices = @transform_2, window_bounds = array<i64: 1, 8, 128>}]} {
    %c0_i32 = arith.constant 0 : i32
    %0 = arith.cmpi eq, %arg1, %c0_i32 : i32
    %1 = arith.extui %0 : i1 to i32
    %c0_i32_0 = arith.constant 0 : i32
    %2 = arith.cmpi ne, %1, %c0_i32_0 : i32
    scf.if %2 {
      %cst_16 = arith.constant 0.000000e+00 : f32
      %33 = vector.broadcast %cst_16 : f32 to vector<1x8x128xf32>
      %c0_17 = arith.constant 0 : index
      %c0_18 = arith.constant 0 : index
      %c0_19 = arith.constant 0 : index
      %34 = vector.load %arg4[%c0_17, %c0_18, %c0_19] : memref<1x8x128xf32, #tpu.memory_space<vmem>>, vector<1x8x128xf32>
      tpu.vector_store %arg4[%c0_17, %c0_18, %c0_19], %33 {strides = array<i32>} : memref<1x8x128xf32, #tpu.memory_space<vmem>>, vector<1x8x128xf32>,
    } else {
    }
    %c0 = arith.constant 0 : index
    %c0_1 = arith.constant 0 : index
    %3 = vector.load %arg2[%c0, %c0_1] : memref<16x128xf32, #tpu.memory_space<vmem>>, vector<16x128xf32>
    %c0_2 = arith.constant 0 : index
    %c0_3 = arith.constant 0 : index
    %4 = vector.load %arg3[%c0_2, %c0_3] : memref<16x128xf32, #tpu.memory_space<vmem>>, vector<16x128xf32>
    %5 = math.absf %3 : vector<16x128xf32>
    %cst = arith.constant 0.000000e+00 : f32
    %6 = vector.broadcast %cst : f32 to vector<16x128xf32>
    %7 = arith.subf %6, %5 : vector<16x128xf32>
    %8 = math.exp %7 : vector<16x128xf32>
    %9 = math.log1p %8 : vector<16x128xf32>
    %cst_4 = arith.constant 0.000000e+00 : f32
    %10 = vector.broadcast %cst_4 : f32 to vector<16x128xf32>
    %11 = arith.maximumf %3, %10 : vector<16x128xf32>
    %12 = arith.mulf %3, %4 : vector<16x128xf32>
    %13 = arith.subf %11, %12 : vector<16x128xf32>
    %14 = arith.addf %13, %9 : vector<16x128xf32>
    %cst_5 = arith.constant 0.000000e+00 : f32
    %15 = vector.broadcast %cst_5 : f32 to vector<16x128xf32>
    %16 = arith.subf %15, %14 : vector<16x128xf32>
    %17 = math.exp %16 : vector<16x128xf32>
    %cst_6 = arith.constant 1.000000e+00 : f32
    %18 = vector.broadcast %cst_6 : f32 to vector<16x128xf32>
    %19 = arith.subf %18, %17 : vector<16x128xf32>
    %20 = arith.mulf %19, %19 : vector<16x128xf32>
    %cst_7 = arith.constant 8.000000e-01 : f32
    %21 = vector.broadcast %cst_7 : f32 to vector<16x128xf32>
    %22 = arith.mulf %21, %4 : vector<16x128xf32>
    %cst_8 = arith.constant 1.000000e-01 : f32
    %23 = vector.broadcast %cst_8 : f32 to vector<16x128xf32>
    %24 = arith.addf %23, %22 : vector<16x128xf32>
    %25 = arith.mulf %24, %20 : vector<16x128xf32>
    %26 = arith.mulf %25, %14 : vector<16x128xf32>
    %c0_9 = arith.constant 0 : index
    %c0_10 = arith.constant 0 : index
    %c0_11 = arith.constant 0 : index
    %27 = vector.load %arg4[%c0_9, %c0_10, %c0_11] : memref<1x8x128xf32, #tpu.memory_space<vmem>>, vector<1x8x128xf32>
    %28 = vector.shape_cast %26 : vector<16x128xf32> to vector<2x8x128xf32>
    %cst_12 = arith.constant dense<0.000000e+00> : vector<8x128xf32>
    %29 = vector.multi_reduction <add>, %28, %cst_12 [0] : vector<2x8x128xf32> to vector<8x128xf32>
    %30 = vector.shape_cast %29 : vector<8x128xf32> to vector<1x8x128xf32>
    %31 = arith.addf %27, %30 : vector<1x8x128xf32>
    %c0_13 = arith.constant 0 : index
    %c0_14 = arith.constant 0 : index
    %c0_15 = arith.constant 0 : index
    %32 = vector.load %arg4[%c0_13, %c0_14, %c0_15] : memref<1x8x128xf32, #tpu.memory_space<vmem>>, vector<1x8x128xf32>
    tpu.vector_store %arg4[%c0_13, %c0_14, %c0_15], %31 {strides = array<i32>} : memref<1x8x128xf32, #tpu.memory_space<vmem>>, vector<1x8x128xf32>,
    return
  }
  func.func @transform_0(%arg0: i32, %arg1: i32) -> (i32, i32) {
    %c1_i32 = arith.constant 1 : i32
    %0 = arith.muli %arg0, %c1_i32 : i32
    %1 = arith.addi %0, %arg1 : i32
    %c0_i32 = arith.constant 0 : i32
    %c0_i32_0 = arith.constant 0 : i32
    return %1, %c0_i32 : i32, i32
  }
  func.func @transform_1(%arg0: i32, %arg1: i32) -> (i32, i32) {
    %c1_i32 = arith.constant 1 : i32
    %0 = arith.muli %arg0, %c1_i32 : i32
    %1 = arith.addi %0, %arg1 : i32
    %c0_i32 = arith.constant 0 : i32
    %c0_i32_0 = arith.constant 0 : i32
    return %1, %c0_i32 : i32, i32
  }
  func.func @transform_2(%arg0: i32, %arg1: i32) -> (i32, i32, i32) {
    %c0_i32 = arith.constant 0 : i32
    %c0_i32_0 = arith.constant 0 : i32
    %c0_i32_1 = arith.constant 0 : i32
    return %arg0, %c0_i32, %c0_i32_0 : i32, i32, i32
  }
}

</mosaic_0001>

<bundles_post_ra>
// kernel: tpu_custom_call.1
= control target key start
LH: loop header
LB: loop body
LE: loop exit
PB: predicated region body
PF: predicated region fallthrough
CT: control target
= control target key end

     0   :  { %7 = vsyncpa [#allocation3], 0  ;;  %s279_s0 = inlined_call_operand.hbm [shape: f32[16,128], index: 0, kind: input, shape index: {}]   ;;  %s280_s1 = inlined_call_operand.hbm [shape: f32[16,128], index: 1, kind: input, shape index: {}]   ;;  %s281_s2 = inlined_call_operand.hbm [shape: f32[1,8,128], index: 2, kind: output, shape index: {}]  }
   0x1   :  { %8 = vsyncpa [#allocation6], 0 }
   0x2   :  { %9 = vsyncpa [#allocation4], 0  ;;  %s223_s9 = smov [#allocation2]   ;;  %s151_s13 = scalar_lea.hbm %s279_s0, 256 }
   0x3   :  { %s19_s10 = sshll.u32 %s223_s9, 4  ;;  %p152_p0 = scmp.ne.s32.totalorder %s279_s0, %s151_s13  ;;  %s20_s10 = int_to_ptr.vmem [resolvable:$true] %s19_s10 }
   0x4   :  { %p155_p1 = scmp.lt.u32.totalorder %s151_s13, %s279_s0 }
   0x6   :  { %p157_p2 = pnand %p155_p1, %p152_p0 }
   0x8   :  { %160 = shalt.err (!%p157_p2)
}
   0x9   :  { %s161_s18 = scalar_lea.vmem %s20_s10, 256  ;;  %p166_p4 = scmp.lt.s32.totalorder %s20_s10, %s20_s10 }
   0xa   :  { %p162_p3 = scmp.ne.s32.totalorder %s20_s10, %s161_s18  ;;  %p167_p5 = scmp.lt.s32.totalorder %s161_s18, %s161_s18 }
   0xc   :  { %p168_p6 = por %p167_p5, %p166_p4 }
   0xe   :  { %p169_p7 = pnand %p168_p6, %p162_p3 }
  0x10   :  { %172 = shalt.err (!%p169_p7)
}
  0x11   :  { %s224_s19 = smov 128   ;;  %s225_s20 = smov 8  }
  0x12   :  { %25 = dma.hbm_to_vmem [thread:$0]  %s279_s0, 256, %s20_s10, [#allocation3], %s224_s19, %s224_s19, %s225_s20  }
  0x13   :  { %s226_s23 = smov [#allocation5]   ;;  %s173_s27 = scalar_lea.hbm %s280_s1, 256 }
  0x14   :  { %s35_s24 = sshll.u32 %s226_s23, 4  ;;  %p174_p8 = scmp.ne.s32.totalorder %s280_s1, %s173_s27  ;;  %s36_s24 = int_to_ptr.vmem [resolvable:$true] %s35_s24 }
  0x15   :  { %p177_p9 = scmp.lt.u32.totalorder %s173_s27, %s280_s1 }
  0x17   :  { %p179_p10 = pnand %p177_p9, %p174_p8 }
  0x19   :  { %182 = shalt.err (!%p179_p10)
}
  0x1a   :  { %s183_s4 = scalar_lea.vmem %s36_s24, 256  ;;  %p188_p12 = scmp.lt.s32.totalorder %s36_s24, %s36_s24 }
  0x1b   :  { %p184_p11 = scmp.ne.s32.totalorder %s36_s24, %s183_s4  ;;  %p189_p13 = scmp.lt.s32.totalorder %s183_s4, %s183_s4 }
  0x1d   :  { %p190_p0 = por %p189_p13, %p188_p12 }
  0x1f   :  { %p191_p1 = pnand %p190_p0, %p184_p11 }
  0x21   :  { %194 = shalt.err (!%p191_p1)
}
  0x22   :  { %41 = dma.hbm_to_vmem [thread:$0]  %s280_s1, 256, %s36_s24, [#allocation6], %s224_s19, %s224_s19, %s225_s20  }
  0x23   :  { %217 = dma.done.wait [#allocation3], 256  }
  0x24   :  { %218 = vsyncadd [#allocation3], 4294967040 }
  0x25   :  { %219 = dma.done.wait [#allocation6], 256  }
  0x26   :  { %220 = vsyncadd [#allocation6], 4294967040  ;;  %v57_v0 = vld [vmem:[#allocation2] sm:$0xff]  ;;  %v58_v1 = vld [vmem:[#allocation2 + $0x8] sm:$0xff]  ;;  %s227_s1 = smov [#allocation7]  }
  0x27   :  { %v61_v2 = vand.u32 2147483647, %v57_v0  ;;  %v62_v3 = vand.u32 2147483647, %v58_v1  ;;  %v59_v14 = vld [vmem:[#allocation5] sm:$0xff]  ;;  %v60_v15 = vld [vmem:[#allocation5 + $0x8] sm:$0xff] }
  0x28   :  { %v87_v19 = vmax.f32 %v57_v0, 0.0  ;;  %v89_v20 = vmul.f32 %v59_v14, %v57_v0  ;;  %v88_v22 = vmax.f32 %v58_v1, 0.0  ;;  %v90_v23 = vmul.f32 %v60_v15, %v58_v1  ;;  %s123_s6 = sshll.u32 %s227_s1, 4  ;;  %s124_s6 = int_to_ptr.vmem [resolvable:$true] %s123_s6 }
  0x29   :  { %v63_v4 = vsub.f32 0.0, %v61_v2  ;;  %v64_v5 = vsub.f32 0.0, %v62_v3  ;;  %v105_v40 = vmul.f32 0.8, %v59_v14  ;;  %v106_v41 = vmul.f32 0.8, %v60_v15  ;;  %p200_p3 = scmp.lt.s32.totalorder %s124_s6, %s124_s6 }
  0x2a   :  { %v91_v27 = vsub.f32 %v87_v19, %v89_v20  ;;  %v92_v30 = vsub.f32 %v88_v22, %v90_v23  ;;  %s195_s7 = scalar_lea.vmem %s124_s6, 128 }
  0x2b   :  { %v65_v6 = vmul.f32 1.442695, %v63_v4  ;;  %v67_v7 = vmul.f32 1.442695, %v64_v5  ;;  %v107_v45 = vadd.f32 0.1, %v105_v40  ;;  %p196_p2 = scmp.ne.s32.totalorder %s124_s6, %s195_s7  ;;  %p201_p4 = scmp.lt.s32.totalorder %s195_s7, %s195_s7 }
  0x2c   :  { %v108_v47 = vadd.f32 0.1, %v106_v41 }
  0x2d   :  { %139 = vpow2.f32 %v65_v6  ;;  %p202_p5 = por %p201_p4, %p200_p3 }
  0x2e   :  { %141 = vpow2.f32 %v67_v7 }
  0x2f   :  { %p203_p6 = pnand %p202_p5, %p196_p2 }
  0x37   :  { %v140_v8 = vpop.eup %139 }
  0x38   :  { %v142_v9 = vpop.eup %141  ;;  %v69_v10 = vadd.f32 1.0, %v140_v8  ;;  %v72_v12 = vmul.f32 -0.5, %v140_v8  ;;  %v75_v17 = vand.u32 2147483647, %v140_v8 }
  0x39   :  { %v78_v11 = vadd.f32 1.0, %v142_v9  ;;  %v81_v13 = vmul.f32 -0.5, %v142_v9  ;;  %v84_v21 = vand.u32 2147483647, %v142_v9 }
  0x3a   :  { %143 = vlog2.f32 %v69_v10  ;;  %v73_v16 = vadd.f32 1.0, %v72_v12  ;;  %vm76_vm0 = vcmp.lt.f32.partialorder %v75_v17, 0.0004427343 }
  0x3b   :  { %145 = vlog2.f32 %v78_v11  ;;  %v82_v18 = vadd.f32 1.0, %v81_v13  ;;  %vm85_vm1 = vcmp.lt.f32.partialorder %v84_v21, 0.0004427343 }
  0x3c   :  { %v74_v24 = vmul.f32 %v140_v8, %v73_v16 }
  0x3d   :  { %v83_v26 = vmul.f32 %v142_v9, %v82_v18 }
  0x44   :  { %v144_v25 = vpop.eup %143 }
  0x45   :  { %v146_v28 = vpop.eup %145  ;;  %v71_v29 = vmul.f32 0.6931472, %v144_v25 }
  0x46   :  { %v80_v31 = vmul.f32 0.6931472, %v146_v28 }
  0x47   :  { %v77_v32 = vsel %vm76_vm0, %v74_v24, %v71_v29 }
  0x48   :  { %v86_v33 = vsel %vm85_vm1, %v83_v26, %v80_v31  ;;  %v93_v34 = vadd.f32 %v91_v27, %v77_v32 }
  0x49   :  { %v94_v35 = vadd.f32 %v92_v30, %v86_v33 }
  0x4a   :  { %v95_v36 = vsub.f32 0.0, %v93_v34 }
  0x4b   :  { %v96_v37 = vsub.f32 0.0, %v94_v35 }
  0x4c   :  { %v97_v38 = vmul.f32 1.442695, %v95_v36 }
  0x4d   :  { %v99_v39 = vmul.f32 1.442695, %v96_v37 }
  0x4e   :  { %147 = vpow2.f32 %v97_v38 }
  0x4f   :  { %149 = vpow2.f32 %v99_v39 }
  0x58   :  { %v148_v42 = vpop.eup %147 }
  0x59   :  { %v150_v43 = vpop.eup %149  ;;  %v101_v44 = vsub.f32 1.0, %v148_v42 }
  0x5a   :  { %v102_v46 = vsub.f32 1.0, %v150_v43 }
  0x5b   :  { %v103_v48 = vmul.f32 %v101_v44, %v101_v44 }
  0x5c   :  { %v104_v49 = vmul.f32 %v102_v46, %v102_v46 }
  0x5d   :  { %v109_v50 = vmul.f32 %v107_v45, %v103_v48 }
  0x5e   :  { %v110_v51 = vmul.f32 %v108_v47, %v104_v49 }
  0x5f   :  { %v111_v52 = vmul.f32 %v109_v50, %v93_v34 }
  0x60   :  { %v112_v53 = vmul.f32 %v110_v51, %v94_v35 }
  0x62   :  { %v114_v54 = vadd.f32 %v112_v53, %v111_v52 }
  0x64   :  { %116 = vst [vmem:[#allocation7] sm:$0xff] %v114_v54 }
  0x65   :  { %206 = shalt.err (!%p203_p6)
}
  0x66   :  { %s207_s10 = scalar_lea.hbm %s281_s2, 128 }
  0x67   :  { %p208_p7 = scmp.ne.s32.totalorder %s281_s2, %s207_s10  ;;  %p211_p8 = scmp.lt.u32.totalorder %s207_s10, %s281_s2 }
  0x69   :  { %p213_p9 = pnand %p211_p8, %p208_p7 }
  0x6b   :  { %216 = shalt.err (!%p213_p9)
}
  0x6c   :  { %126 = dma.vmem_to_hbm [thread:$0]  %s124_s6, 128, %s281_s2, [#allocation4]  }
  0x6d   :  { %221 = dma.done.wait [#allocation4], 128  }
  0x6e   :  { %222 = vsyncadd [#allocation4], 4294967168 }
  0x6f   :  { %130 = vsyncpa [#allocation3], 1 }
  0x70   :  { %131 = vsyncpa [#allocation6], 1 }
  0x71   :  { %132 = vsyncpa [#allocation4], 1 }

</bundles_post_ra>
